<compile_context>
chip_gen: v7x
topology: tpu7x:2x2x1
jax: 0.10.0
libtpu: 0.0.40
codegen_flags: <defaults>
</compile_context>

<pallas_src>
import numpy as np
import jax
import jax.numpy as jnp
from jax.experimental import pallas as pl
from jax.experimental.pallas import tpu as pltpu

F_PAD = 128  # lane-dense feature width (all in/hidden/out dims padded to this)


def _round_up(x, m):
    return (x + m - 1) // m * m


def _make_kernel(num_layers):
    """Kernel over one batch tile: num_layers x (linear -> relu -> mask-mul) + final linear."""

    def net_kernel(x_ref, w_ref, b_ref, mask_ref, out_ref):
        h = x_ref[...]
        for i in range(num_layers):
            h = jnp.dot(h, w_ref[i], preferred_element_type=jnp.float32)
            h = jnp.maximum(h + b_ref[i:i + 1, :], 0.0)
            h = h * mask_ref[i]                       # pre-scaled dropout mask: one vmul
        y = jnp.dot(h, w_ref[num_layers], preferred_element_type=jnp.float32)
        out_ref[...] = y + b_ref[num_layers:num_layers + 1, :]

    return net_kernel


def make_dropout_masks(key, batch, layer_width, num_layers, drop_p,
                       drop_bool=True, drop_bool_ll=True):
    """Pre-scaled inverted-dropout masks, matching F.dropout semantics.

    Training: mask = Bernoulli(1-p) / (1-p)  (keep iff u >= p).
    Eval:     mask = 1.
    The last hidden dropout uses drop_bool_ll, the others drop_bool.
    """
    u = jax.random.uniform(key, (num_layers, batch, layer_width), dtype=jnp.float32)
    keep = (u >= drop_p).astype(jnp.float32) / (1.0 - drop_p)
    flags = jnp.asarray([drop_bool] * (num_layers - 1) + [drop_bool_ll],
                        dtype=jnp.float32).reshape(num_layers, 1, 1)
    return flags * keep + (1.0 - flags)


def net_swa_forward(x, params, drop_masks):
    """Fused forward pass.

    x:          [B, n_input] f32
    params:     list of (W [in, out], b [out]) for num_layers+1 Linear layers
                (W stored transposed vs nn.Linear so the kernel computes h @ W + b)
    drop_masks: [num_layers, B, layer_width] pre-scaled dropout masks
    returns     [B, n_output] f32
    """
    num_layers = len(params) - 1
    B, n_input = x.shape
    n_output = params[-1][0].shape[1]
    layer_width = params[0][0].shape[1] if num_layers > 0 else n_input

    # --- batch tiling: sublane-aligned, capped so VMEM stays tiny even on v7x ---
    tile_b = _round_up(B, 8)
    if tile_b > 512:
        tile_b = 512
    b_pad = _round_up(B, tile_b)

    # --- pad + consolidate operands (lane-dense 128-wide features) ---
    x_p = jnp.zeros((b_pad, F_PAD), jnp.float32).at[:B, :n_input].set(x)

    w_stack = jnp.zeros((num_layers + 1, F_PAD, F_PAD), jnp.float32)
    b_stack = jnp.zeros((num_layers + 1, F_PAD), jnp.float32)
    for i, (w, b) in enumerate(params):
        fin, fout = w.shape
        w_stack = w_stack.at[i, :fin, :fout].set(w)
        b_stack = b_stack.at[i, :fout].set(jnp.reshape(b, (-1,)))

    m_stack = jnp.zeros((num_layers, b_pad, F_PAD), jnp.float32)
    m_stack = m_stack.at[:, :B, :layer_width].set(drop_masks)

    grid = (b_pad // tile_b,)
    out = pl.pallas_call(
        _make_kernel(num_layers),
        out_shape=jax.ShapeDtypeStruct((b_pad, F_PAD), jnp.float32),
        grid_spec=pltpu.PrefetchScalarGridSpec(
            num_scalar_prefetch=0,
            grid=grid,
            in_specs=[
                pl.BlockSpec((tile_b, F_PAD), lambda i: (i, 0)),                     # x tile
                pl.BlockSpec((num_layers + 1, F_PAD, F_PAD), lambda i: (0, 0, 0)),   # weights (broadcast)
                pl.BlockSpec((num_layers + 1, F_PAD), lambda i: (0, 0)),             # biases  (broadcast)
                pl.BlockSpec((num_layers, tile_b, F_PAD), lambda i: (0, i, 0)),      # masks tile
            ],
            out_specs=pl.BlockSpec((tile_b, F_PAD), lambda i: (i, 0)),
        ),
        compiler_params=pltpu.CompilerParams(
            dimension_semantics=("parallel",)),
    )(x_p, w_stack, b_stack, m_stack)

    return out[:B, :n_output]


def net_swa_reference(x, params, drop_masks):
    """Pure-JAX reference with identical semantics (for correctness check)."""
    num_layers = len(params) - 1
    h = x
    for i in range(num_layers):
        w, b = params[i]
        h = jax.nn.relu(h @ w + b)
        h = h * drop_masks[i]
    w, b = params[num_layers]
    return h @ w + b


if __name__ == "__main__":
    # Small config consistent with the module: 1-D regression MLP.
    B = 8
    n_input = 4
    layer_width = 32
    num_layers = 3          # -> 4 Linear layers, 3 dropout applications
    n_output = 1
    drop_p = 0.1

    key = jax.random.PRNGKey(0)

    # Deterministic parameter init (same scale as corr_init_matrix: ~sqrt(1/in)).
    layer_dims = [(n_input, layer_width)] \
        + [(layer_width, layer_width)] * (num_layers - 1) \
        + [(layer_width, n_output)]
    params = []
    for (fin, fout) in layer_dims:
        key, kw, kb = jax.random.split(key, 3)
        w = jax.random.normal(kw, (fin, fout), dtype=jnp.float32) * jnp.sqrt(1.0 / fin)
        b = jax.random.uniform(kb, (fout,), dtype=jnp.float32,
                               minval=-1.0 / np.sqrt(fin), maxval=1.0 / np.sqrt(fin))
        params.append((w, b))

    # Input and deterministic dropout noise (training mode: drop_bool = drop_bool_ll = True).
    key, kx, ku = jax.random.split(key, 3)
    x = jax.random.normal(kx, (B, n_input), dtype=jnp.float32)
    drop_masks = make_dropout_masks(ku, B, layer_width, num_layers, drop_p,
                                    drop_bool=True, drop_bool_ll=True)

    out = jax.block_until_ready(net_swa_forward(x, params, drop_masks))
    ref = jax.block_until_ready(net_swa_reference(x, params, drop_masks))
    np.testing.assert_allclose(np.asarray(out), np.asarray(ref), rtol=1e-4, atol=1e-5)

    print("KERNEL_OK")
</pallas_src>

<mosaic_0001>
module attributes {stable_mosaic.version = 11 : i64} {
  func.func @net_kernel(%arg0: i32, %arg1: memref<8x128xf32, #tpu.memory_space<vmem>>, %arg2: memref<4x128x128xf32, #tpu.memory_space<vmem>>, %arg3: memref<4x128xf32, #tpu.memory_space<vmem>>, %arg4: memref<3x8x128xf32, #tpu.memory_space<vmem>>, %arg5: memref<8x128xf32, #tpu.memory_space<vmem>>) attributes {dimension_semantics = [#tpu.dimension_semantics<parallel>], iteration_bounds = array<i64: 1>, scalar_prefetch = 0 : i64, scratch_operands = 0 : i64, tpu.core_type = #tpu.core_type<tc>, window_params = [{transform_indices = @transform_0, window_bounds = array<i64: 8, 128>}, {pipeline_mode = #tpu.pipeline_mode<synchronous>, transform_indices = @transform_1, window_bounds = array<i64: 4, 128, 128>}, {pipeline_mode = #tpu.pipeline_mode<synchronous>, transform_indices = @transform_2, window_bounds = array<i64: 4, 128>}, {transform_indices = @transform_3, window_bounds = array<i64: 3, 8, 128>}, {transform_indices = @transform_4, window_bounds = array<i64: 8, 128>}]} {
    %c0 = arith.constant 0 : index
    %c0_0 = arith.constant 0 : index
    %0 = vector.load %arg1[%c0, %c0_0] : memref<8x128xf32, #tpu.memory_space<vmem>>, vector<8x128xf32>
    %c0_1 = arith.constant 0 : index
    %c0_2 = arith.constant 0 : index
    %c0_3 = arith.constant 0 : index
    %1 = vector.load %arg2[%c0_1, %c0_2, %c0_3] : memref<4x128x128xf32, #tpu.memory_space<vmem>>, vector<1x128x128xf32>
    %2 = vector.shape_cast %1 : vector<1x128x128xf32> to vector<128x128xf32>
    %cst = arith.constant dense<0.000000e+00> : vector<8x128xf32>
    %3 = tpu.matmul %0, %2, %cst {dimension_numbers = #tpu.dot_dimension_numbers<[1], [0], [0], [1], [0, 0, 1, 1], [], []>} : vector<8x128xf32>, vector<128x128xf32>, vector<8x128xf32> -> vector<8x128xf32>
    %c0_4 = arith.constant 0 : index
    %c0_5 = arith.constant 0 : index
    %4 = vector.load %arg3[%c0_4, %c0_5] : memref<4x128xf32, #tpu.memory_space<vmem>>, vector<1x128xf32>
    %5 = vector.broadcast %4 : vector<1x128xf32> to vector<8x128xf32>
    %6 = arith.addf %3, %5 : vector<8x128xf32>
    %cst_6 = arith.constant 0.000000e+00 : f32
    %7 = vector.broadcast %cst_6 : f32 to vector<8x128xf32>
    %8 = arith.maximumf %6, %7 : vector<8x128xf32>
    %c0_7 = arith.constant 0 : index
    %c0_8 = arith.constant 0 : index
    %c0_9 = arith.constant 0 : index
    %9 = vector.load %arg4[%c0_7, %c0_8, %c0_9] : memref<3x8x128xf32, #tpu.memory_space<vmem>>, vector<1x8x128xf32>
    %10 = vector.shape_cast %9 : vector<1x8x128xf32> to vector<8x128xf32>
    %11 = arith.mulf %8, %10 : vector<8x128xf32>
    %c1 = arith.constant 1 : index
    %c0_10 = arith.constant 0 : index
    %c0_11 = arith.constant 0 : index
    %12 = vector.load %arg2[%c1, %c0_10, %c0_11] : memref<4x128x128xf32, #tpu.memory_space<vmem>>, vector<1x128x128xf32>
    %13 = vector.shape_cast %12 : vector<1x128x128xf32> to vector<128x128xf32>
    %cst_12 = arith.constant dense<0.000000e+00> : vector<8x128xf32>
    %14 = tpu.matmul %11, %13, %cst_12 {dimension_numbers = #tpu.dot_dimension_numbers<[1], [0], [0], [1], [0, 0, 1, 1], [], []>} : vector<8x128xf32>, vector<128x128xf32>, vector<8x128xf32> -> vector<8x128xf32>
    %c1_13 = arith.constant 1 : index
    %c0_14 = arith.constant 0 : index
    %15 = vector.load %arg3[%c1_13, %c0_14] : memref<4x128xf32, #tpu.memory_space<vmem>>, vector<1x128xf32>
    %16 = vector.broadcast %15 : vector<1x128xf32> to vector<8x128xf32>
    %17 = arith.addf %14, %16 : vector<8x128xf32>
    %cst_15 = arith.constant 0.000000e+00 : f32
    %18 = vector.broadcast %cst_15 : f32 to vector<8x128xf32>
    %19 = arith.maximumf %17, %18 : vector<8x128xf32>
    %c1_16 = arith.constant 1 : index
    %c0_17 = arith.constant 0 : index
    %c0_18 = arith.constant 0 : index
    %20 = vector.load %arg4[%c1_16, %c0_17, %c0_18] : memref<3x8x128xf32, #tpu.memory_space<vmem>>, vector<1x8x128xf32>
    %21 = vector.shape_cast %20 : vector<1x8x128xf32> to vector<8x128xf32>
    %22 = arith.mulf %19, %21 : vector<8x128xf32>
    %c2 = arith.constant 2 : index
    %c0_19 = arith.constant 0 : index
    %c0_20 = arith.constant 0 : index
    %23 = vector.load %arg2[%c2, %c0_19, %c0_20] : memref<4x128x128xf32, #tpu.memory_space<vmem>>, vector<1x128x128xf32>
    %24 = vector.shape_cast %23 : vector<1x128x128xf32> to vector<128x128xf32>
    %cst_21 = arith.constant dense<0.000000e+00> : vector<8x128xf32>
    %25 = tpu.matmul %22, %24, %cst_21 {dimension_numbers = #tpu.dot_dimension_numbers<[1], [0], [0], [1], [0, 0, 1, 1], [], []>} : vector<8x128xf32>, vector<128x128xf32>, vector<8x128xf32> -> vector<8x128xf32>
    %c2_22 = arith.constant 2 : index
    %c0_23 = arith.constant 0 : index
    %26 = vector.load %arg3[%c2_22, %c0_23] : memref<4x128xf32, #tpu.memory_space<vmem>>, vector<1x128xf32>
    %27 = vector.broadcast %26 : vector<1x128xf32> to vector<8x128xf32>
    %28 = arith.addf %25, %27 : vector<8x128xf32>
    %cst_24 = arith.constant 0.000000e+00 : f32
    %29 = vector.broadcast %cst_24 : f32 to vector<8x128xf32>
    %30 = arith.maximumf %28, %29 : vector<8x128xf32>
    %c2_25 = arith.constant 2 : index
    %c0_26 = arith.constant 0 : index
    %c0_27 = arith.constant 0 : index
    %31 = vector.load %arg4[%c2_25, %c0_26, %c0_27] : memref<3x8x128xf32, #tpu.memory_space<vmem>>, vector<1x8x128xf32>
    %32 = vector.shape_cast %31 : vector<1x8x128xf32> to vector<8x128xf32>
    %33 = arith.mulf %30, %32 : vector<8x128xf32>
    %c3 = arith.constant 3 : index
    %c0_28 = arith.constant 0 : index
    %c0_29 = arith.constant 0 : index
    %34 = vector.load %arg2[%c3, %c0_28, %c0_29] : memref<4x128x128xf32, #tpu.memory_space<vmem>>, vector<1x128x128xf32>
    %35 = vector.shape_cast %34 : vector<1x128x128xf32> to vector<128x128xf32>
    %cst_30 = arith.constant dense<0.000000e+00> : vector<8x128xf32>
    %36 = tpu.matmul %33, %35, %cst_30 {dimension_numbers = #tpu.dot_dimension_numbers<[1], [0], [0], [1], [0, 0, 1, 1], [], []>} : vector<8x128xf32>, vector<128x128xf32>, vector<8x128xf32> -> vector<8x128xf32>
    %c3_31 = arith.constant 3 : index
    %c0_32 = arith.constant 0 : index
    %37 = vector.load %arg3[%c3_31, %c0_32] : memref<4x128xf32, #tpu.memory_space<vmem>>, vector<1x128xf32>
    %38 = vector.broadcast %37 : vector<1x128xf32> to vector<8x128xf32>
    %39 = arith.addf %36, %38 : vector<8x128xf32>
    %c0_33 = arith.constant 0 : index
    %c0_34 = arith.constant 0 : index
    %40 = vector.load %arg5[%c0_33, %c0_34] : memref<8x128xf32, #tpu.memory_space<vmem>>, vector<8x128xf32>
    tpu.vector_store %arg5[%c0_33, %c0_34], %39 {strides = array<i32>} : memref<8x128xf32, #tpu.memory_space<vmem>>, vector<8x128xf32>,
    return
  }
  func.func @transform_0(%arg0: i32) -> (i32, i32) {
    %c0_i32 = arith.constant 0 : i32
    %c0_i32_0 = arith.constant 0 : i32
    return %arg0, %c0_i32 : i32, i32
  }
  func.func @transform_1(%arg0: i32) -> (i32, i32, i32) {
    %c0_i32 = arith.constant 0 : i32
    %c0_i32_0 = arith.constant 0 : i32
    %c0_i32_1 = arith.constant 0 : i32
    %c0_i32_2 = arith.constant 0 : i32
    return %c0_i32, %c0_i32_0, %c0_i32_1 : i32, i32, i32
  }
  func.func @transform_2(%arg0: i32) -> (i32, i32) {
    %c0_i32 = arith.constant 0 : i32
    %c0_i32_0 = arith.constant 0 : i32
    %c0_i32_1 = arith.constant 0 : i32
    return %c0_i32, %c0_i32_0 : i32, i32
  }
  func.func @transform_3(%arg0: i32) -> (i32, i32, i32) {
    %c0_i32 = arith.constant 0 : i32
    %c0_i32_0 = arith.constant 0 : i32
    %c0_i32_1 = arith.constant 0 : i32
    return %c0_i32, %arg0, %c0_i32_0 : i32, i32, i32
  }
  func.func @transform_4(%arg0: i32) -> (i32, i32) {
    %c0_i32 = arith.constant 0 : i32
    %c0_i32_0 = arith.constant 0 : i32
    return %arg0, %c0_i32 : i32, i32
  }
}

</mosaic_0001>

<bundles_post_ra>
// kernel: tpu_custom_call.1
= control target key start
LH: loop header
LB: loop body
LE: loop exit
PB: predicated region body
PF: predicated region fallthrough
CT: control target
= control target key end

     0   :  { %9 = vsyncpa [#allocation3], 0  ;;  %s1004_s0 = inlined_call_operand.hbm [shape: f32[8,128], index: 0, kind: input, shape index: {}]   ;;  %s1005_s1 = inlined_call_operand.hbm [shape: f32[4,128,128], index: 1, kind: input, shape index: {}]   ;;  %s1006_s2 = inlined_call_operand.vmem [shape: f32[4,128], index: 2, kind: input, shape index: {}]   ;;  %s1007_s3 = inlined_call_operand.hbm [shape: f32[3,8,128], index: 3, kind: input, shape index: {}]   ;;  %s1008_s4 = inlined_call_operand.hbm [shape: f32[8,128], index: 4, kind: output, shape index: {}]  }
   0x1   :  { %10 = vsyncpa [#allocation6], 0 }
   0x2   :  { %11 = vsyncpa [#allocation4], 0  ;;  %s864_s15 = smov [#allocation5]   ;;  %s770_s19 = scalar_lea.hbm %s1005_s1, 8192 }
   0x3   :  { %s27_s16 = sshll.u32 %s864_s15, 4  ;;  %p771_p0 = scmp.ne.s32.totalorder %s1005_s1, %s770_s19  ;;  %s28_s16 = int_to_ptr.vmem [resolvable:$true] %s27_s16 }
   0x4   :  { %p774_p1 = scmp.lt.u32.totalorder %s770_s19, %s1005_s1 }
   0x6   :  { %p776_p2 = pnand %p774_p1, %p771_p0 }
   0x8   :  { %779 = shalt.err (!%p776_p2)
}
   0x9   :  { %s780_s24 = scalar_lea.vmem %s28_s16, 8192  ;;  %p785_p4 = scmp.lt.s32.totalorder %s28_s16, %s28_s16 }
   0xa   :  { %p781_p3 = scmp.ne.s32.totalorder %s28_s16, %s780_s24  ;;  %p786_p5 = scmp.lt.s32.totalorder %s780_s24, %s780_s24 }
   0xc   :  { %p787_p6 = por %p786_p5, %p785_p4 }
   0xe   :  { %p788_p7 = pnand %p787_p6, %p781_p3 }
  0x10   :  { %791 = shalt.err (!%p788_p7)
}
  0x11   :  { %s865_s25 = smov 128   ;;  %s866_s26 = smov 8  }
  0x12   :  { %33 = dma.hbm_to_vmem [thread:$0]  %s1005_s1, 8192, %s28_s16, [#allocation6], %s865_s25, %s865_s25, %s866_s26  }
  0x13   :  { %s867_s29 = smov [#allocation2]   ;;  %s868_s5 = smov [#allocation7]  }
  0x14   :  { %s18_s30 = sshll.u32 %s867_s29, 4  ;;  %s41_s6 = sshll.u32 %s868_s5, 4  ;;  %s19_s30 = int_to_ptr.vmem [resolvable:$true] %s18_s30  ;;  %s42_s6 = int_to_ptr.vmem [resolvable:$true] %s41_s6 }
  0x15   :  { %s792_s9 = scalar_lea.hbm %s1004_s0, 128 }
  0x16   :  { %p793_p8 = scmp.ne.s32.totalorder %s1004_s0, %s792_s9  ;;  %p796_p9 = scmp.lt.u32.totalorder %s792_s9, %s1004_s0 }
  0x18   :  { %p798_p10 = pnand %p796_p9, %p793_p8 }
  0x1a   :  { %801 = shalt.err (!%p798_p10)
}
  0x1b   :  { %s802_s1 = scalar_lea.vmem %s19_s30, 128  ;;  %p807_p12 = scmp.lt.s32.totalorder %s19_s30, %s19_s30 }
  0x1c   :  { %p803_p11 = scmp.ne.s32.totalorder %s19_s30, %s802_s1  ;;  %p808_p13 = scmp.lt.s32.totalorder %s802_s1, %s802_s1 }
  0x1e   :  { %p809_p0 = por %p808_p13, %p807_p12 }
  0x20   :  { %p810_p1 = pnand %p809_p0, %p803_p11 }
  0x22   :  { %813 = shalt.err (!%p810_p1)
}
  0x23   :  { %21 = dma.hbm_to_vmem [thread:$0]  %s1004_s0, 128, %s19_s30, [#allocation3]  }
  0x24   :  { %s814_s18 = scalar_lea.hbm %s1007_s3, 384 }
  0x25   :  { %p815_p2 = scmp.ne.s32.totalorder %s1007_s3, %s814_s18  ;;  %p818_p3 = scmp.lt.u32.totalorder %s814_s18, %s1007_s3 }
  0x27   :  { %p820_p4 = pnand %p818_p3, %p815_p2 }
  0x29   :  { %823 = shalt.err (!%p820_p4)
}
  0x2a   :  { %s824_s23 = scalar_lea.vmem %s42_s6, 384  ;;  %p829_p6 = scmp.lt.s32.totalorder %s42_s6, %s42_s6 }
  0x2b   :  { %p825_p5 = scmp.ne.s32.totalorder %s42_s6, %s824_s23  ;;  %p830_p7 = scmp.lt.s32.totalorder %s824_s23, %s824_s23 }
  0x2d   :  { %p831_p8 = por %p830_p7, %p829_p6 }
  0x2f   :  { %p832_p9 = pnand %p831_p8, %p825_p5 }
  0x31   :  { %835 = shalt.err (!%p832_p9)
}
  0x32   :  { %47 = dma.hbm_to_vmem [thread:$0]  %s1007_s3, 384, %s42_s6, [#allocation6], %s865_s25, %s865_s25, %s866_s26  }
  0x33   :  { %858 = dma.done.wait [#allocation3], 128  }
  0x34   :  { %859 = vsyncadd [#allocation3], 4294967168 }
  0x35   :  { %860 = dma.done.wait [#allocation6], 8576  }
  0x36   :  { %861 = vsyncadd [#allocation6], 4294958720  ;;  %v869_v0 = vmov 0.0|0.0   ;;  %vm870_vm0 = vmmov 0   ;;  %v871_v1 = vmov 0.0   ;;  %v58_v2 = vld [vmem:[#allocation5] sm:$0xff] }
  0x37   :  { %665 = vmatprep.subr.bf16.mxu0 %v869_v0  ;;  %557 = vmatprep.mubr.msk.f32.mxu0 %vm870_vm0, %v871_v1  ;;  %v59_v3 = vld [vmem:[#allocation5 + $0x8] sm:$0xff]  ;;  %v60_v4 = vld [vmem:[#allocation5 + $0x10] sm:$0xff]  ;;  %v61_v6 = vld [vmem:[#allocation5 + $0x18] sm:$0xff]  ;;  %s872_s6 = smov [#allocation8]  }
  0x38   :  { %689 = vmatprep.subr.bf16.mxu1 %v869_v0  ;;  %592 = vmatprep.mubr.msk.f32.mxu1 %vm870_vm0, %v871_v1  ;;  %v666_v5 = vpack.c.bf16 %v59_v3, %v58_v2  ;;  %v669_v7 = vpack.c.bf16 %v61_v6, %v60_v4  ;;  %v62_v8 = vld [vmem:[#allocation5 + $0x20] sm:$0xff]  ;;  %v63_v9 = vld [vmem:[#allocation5 + $0x28] sm:$0xff]  ;;  %v155_v12 = vld [vmem:[#allocation5 + $0x90] sm:$0xff]  ;;  %s443_s7 = sshll.u32 %s872_s6, 4  ;;  %s444_s7 = int_to_ptr.vmem [resolvable:$true] %s443_s7 }
  0x39   :  { %v153_v10 = vld [vmem:[#allocation5 + $0x80] sm:$0xff]  ;;  %v154_v11 = vld [vmem:[#allocation5 + $0x88] sm:$0xff]  ;;  %v156_v13 = vld [vmem:[#allocation5 + $0x98] sm:$0xff]  ;;  %v672_v14 = vpack.c.bf16 %v63_v9, %v62_v8  ;;  %s836_s8 = scalar_lea.vmem %s444_s7, 128  ;;  %p841_p11 = scmp.lt.s32.totalorder %s444_s7, %s444_s7 }
  0x3a   :  { %667 = vmatpush3.bf16.msra.mxu0 %v666_v5  ;;  %v690_v15 = vpack.c.bf16 %v154_v11, %v153_v10  ;;  %v64_v16 = vld [vmem:[#allocation5 + $0x30] sm:$0xff]  ;;  %v65_v17 = vld [vmem:[#allocation5 + $0x38] sm:$0xff]  ;;  %v693_v18 = vpack.c.bf16 %v156_v13, %v155_v12  ;;  %v157_v19 = vld [vmem:[#allocation5 + $0xa0] sm:$0xff]  ;;  %p837_p10 = scmp.ne.s32.totalorder %s444_s7, %s836_s8  ;;  %p842_p12 = scmp.lt.s32.totalorder %s836_s8, %s836_s8 }
  0x3b   :  { %668 = vmatprep.subr.bf16.mxu0 %v869_v0  ;;  %v158_v20 = vld [vmem:[#allocation5 + $0xa8] sm:$0xff]  ;;  %v675_v21 = vpack.c.bf16 %v65_v17, %v64_v16  ;;  %v66_v22 = vld [vmem:[#allocation5 + $0x40] sm:$0xff]  ;;  %v159_v25 = vld [vmem:[#allocation5 + $0xb0] sm:$0xff] }
  0x3c   :  { %691 = vmatpush3.bf16.msra.mxu1 %v690_v15  ;;  %v67_v23 = vld [vmem:[#allocation5 + $0x48] sm:$0xff]  ;;  %v696_v24 = vpack.c.bf16 %v158_v20, %v157_v19  ;;  %v160_v26 = vld [vmem:[#allocation5 + $0xb8] sm:$0xff]  ;;  %v68_v28 = vld [vmem:[#allocation5 + $0x50] sm:$0xff]  ;;  %p843_p13 = por %p842_p12, %p841_p11 }
  0x3d   :  { %692 = vmatprep.subr.bf16.mxu1 %v869_v0  ;;  %v678_v27 = vpack.c.bf16 %v67_v23, %v66_v22  ;;  %v69_v29 = vld [vmem:[#allocation5 + $0x58] sm:$0xff]  ;;  %v699_v30 = vpack.c.bf16 %v160_v26, %v159_v25  ;;  %v161_v31 = vld [vmem:[#allocation5 + $0xc0] sm:$0xff]  ;;  %v162_v32 = vld [vmem:[#allocation5 + $0xc8] sm:$0xff] }
  0x3e   :  { %670 = vmatpush3.bf16.msra.mxu0 %v669_v7  ;;  %v681_v33 = vpack.c.bf16 %v69_v29, %v68_v28  ;;  %v70_v34 = vld [vmem:[#allocation5 + $0x60] sm:$0xff]  ;;  %v71_v35 = vld [vmem:[#allocation5 + $0x68] sm:$0xff]  ;;  %v702_v36 = vpack.c.bf16 %v162_v32, %v161_v31  ;;  %v163_v37 = vld [vmem:[#allocation5 + $0xd0] sm:$0xff]  ;;  %p844_p0 = pnand %p843_p13, %p837_p10 }
  0x3f   :  { %671 = vmatprep.subr.bf16.mxu0 %v869_v0  ;;  %v164_v38 = vld [vmem:[#allocation5 + $0xd8] sm:$0xff]  ;;  %v684_v39 = vpack.c.bf16 %v71_v35, %v70_v34  ;;  %v72_v40 = vld [vmem:[#allocation5 + $0x70] sm:$0xff]  ;;  %v165_v45 = vld [vmem:[#allocation5 + $0xe0] sm:$0xff] }
  0x40   :  { %694 = vmatpush3.bf16.msra.mxu1 %v693_v18  ;;  %v73_v41 = vld [vmem:[#allocation5 + $0x78] sm:$0xff]  ;;  %v705_v42 = vpack.c.bf16 %v164_v38, %v163_v37  ;;  %v166_v46 = vld [vmem:[#allocation5 + $0xe8] sm:$0xff]  ;;  %v167_v48 = vld [vmem:[#allocation5 + $0xf0] sm:$0xff] }
  0x41   :  { %695 = vmatprep.subr.bf16.mxu1 %v869_v0  ;;  %v687_v43 = vpack.c.bf16 %v73_v41, %v72_v40  ;;  %v57_v44 = vld [vmem:[#allocation2] sm:$0xff]  ;;  %v708_v47 = vpack.c.bf16 %v166_v46, %v165_v45  ;;  %v249_v51 = vld [vmem:[#allocation5 + $0x100] sm:$0xff]  ;;  %v250_v52 = vld [vmem:[#allocation5 + $0x108] sm:$0xff] }
  0x42   :  { %673 = vmatpush3.bf16.msra.mxu0 %v672_v14  ;;  %v168_v49 = vld [vmem:[#allocation5 + $0xf8] sm:$0xff]  ;;  %v251_v53 = vld [vmem:[#allocation5 + $0x110] sm:$0xff]  ;;  %v714_v54 = vpack.c.bf16 %v250_v52, %v249_v51  ;;  %v253_v57 = vld [vmem:[#allocation5 + $0x120] sm:$0xff] }
  0x43   :  { %674 = vmatprep.subr.bf16.mxu0 %v869_v0  ;;  %v711_v50 = vpack.c.bf16 %v168_v49, %v167_v48  ;;  %v252_v55 = vld [vmem:[#allocation5 + $0x118] sm:$0xff]  ;;  %v254_v58 = vld [vmem:[#allocation5 + $0x128] sm:$0xff]  ;;  %v255_v60 = vld [vmem:[#allocation5 + $0x130] sm:$0xff] }
  0x44   :  { %697 = vmatpush3.bf16.msra.mxu1 %v696_v24  ;;  %v717_v56 = vpack.c.bf16 %v252_v55, %v251_v53  ;;  %v720_v59 = vpack.c.bf16 %v254_v58, %v253_v57  ;;  %v256_v61 = vld [vmem:[#allocation5 + $0x138] sm:$0xff]  ;;  %v257_v63 = vld [vmem:[#allocation5 + $0x140] sm:$0xff]  ;;  %v258_v2 = vld [vmem:[#allocation5 + $0x148] sm:$0xff] }
  0x45   :  { %698 = vmatprep.subr.bf16.mxu1 %v869_v0  ;;  %v723_v62 = vpack.c.bf16 %v256_v61, %v255_v60  ;;  %v726_v3 = vpack.c.bf16 %v258_v2, %v257_v63  ;;  %v259_v4 = vld [vmem:[#allocation5 + $0x150] sm:$0xff]  ;;  %v260_v5 = vld [vmem:[#allocation5 + $0x158] sm:$0xff]  ;;  %v150_v11 = vld [vmem:[#allocation7] sm:$0xff] }
  0x46   :  { %676 = vmatpush3.bf16.msra.mxu0 %v675_v21  ;;  %v729_v6 = vpack.c.bf16 %v260_v5, %v259_v4  ;;  %v453_v7 = vld [vmem:[%s1006_s2] ss:$0 sm:$0xff]  ;;  %v261_v14 = vld [vmem:[#allocation5 + $0x160] sm:$0xff]  ;;  %v262_v15 = vld [vmem:[#allocation5 + $0x168] sm:$0xff] }
  0x47   :  { %677 = vmatprep.subr.bf16.mxu0 %v869_v0  ;;  %v732_v16 = vpack.c.bf16 %v262_v15, %v261_v14  ;;  %v263_v17 = vld [vmem:[#allocation5 + $0x170] sm:$0xff]  ;;  %v264_v18 = vld [vmem:[#allocation5 + $0x178] sm:$0xff]  ;;  %v345_v20 = vld [vmem:[#allocation5 + $0x180] sm:$0xff] }
  0x48   :  { %700 = vmatpush3.bf16.msra.mxu1 %v699_v30  ;;  %v735_v19 = vpack.c.bf16 %v264_v18, %v263_v17  ;;  %v346_v21 = vld [vmem:[#allocation5 + $0x188] sm:$0xff]  ;;  %v347_v22 = vld [vmem:[#allocation5 + $0x190] sm:$0xff]  ;;  %v348_v24 = vld [vmem:[#allocation5 + $0x198] sm:$0xff] }
  0x49   :  { %701 = vmatprep.subr.bf16.mxu1 %v869_v0  ;;  %v738_v23 = vpack.c.bf16 %v346_v21, %v345_v20  ;;  %v741_v25 = vpack.c.bf16 %v348_v24, %v347_v22  ;;  %v350_v26 = vld [vmem:[#allocation5 + $0x1a8] sm:$0xff]  ;;  %v351_v28 = vld [vmem:[#allocation5 + $0x1b0] sm:$0xff]  ;;  %v352_v29 = vld [vmem:[#allocation5 + $0x1b8] sm:$0xff] }
  0x4a   :  { %679 = vmatpush3.bf16.msra.mxu0 %v678_v27  ;;  %v747_v30 = vpack.c.bf16 %v352_v29, %v351_v28  ;;  %v353_v31 = vld [vmem:[#allocation5 + $0x1c0] sm:$0xff]  ;;  %v354_v32 = vld [vmem:[#allocation5 + $0x1c8] sm:$0xff]  ;;  %v355_v34 = vld [vmem:[#allocation5 + $0x1d0] sm:$0xff] }
  0x4b   :  { %680 = vmatprep.subr.bf16.mxu0 %v869_v0  ;;  %v356_v35 = vld [vmem:[#allocation5 + $0x1d8] sm:$0xff]  ;;  %v246_v41 = vld [vmem:[#allocation7 + $0x8] sm:$0xff] }
  0x4c   :  { %703 = vmatpush3.bf16.msra.mxu1 %v702_v36  ;;  %v753_v36 = vpack.c.bf16 %v356_v35, %v355_v34  ;;  %v454_v37 = vld [vmem:[%s1006_s2 + $0x1] ss:$0 sm:$0xff]  ;;  %v358_v45 = vld [vmem:[#allocation5 + $0x1e8] sm:$0xff]  ;;  %v456_v57 = vld [vmem:[%s1006_s2 + $0x3] ss:$0 sm:$0xff] }
  0x4d   :  { %704 = vmatprep.subr.bf16.mxu1 %v869_v0  ;;  %v360_v48 = vld [vmem:[#allocation5 + $0x1f8] sm:$0xff] }
  0x4e   :  { %682 = vmatpush3.bf16.msra.mxu0 %v681_v33  ;;  %v750_v33 = vpack.c.bf16 %v354_v32, %v353_v31 }
  0x4f   :  { %683 = vmatprep.subr.bf16.mxu0 %v869_v0 }
  0x50   :  { %706 = vmatpush3.bf16.msra.mxu1 %v705_v42 }
  0x51   :  { %707 = vmatprep.subr.bf16.mxu1 %v869_v0 }
  0x52   :  { %685 = vmatpush3.bf16.msra.mxu0 %v684_v39 }
  0x53   :  { %686 = vmatprep.subr.bf16.mxu0 %v869_v0 }
  0x54   :  { %709 = vmatpush3.bf16.msra.mxu1 %v708_v47  ;;  %v359_v47 = vld [vmem:[#allocation5 + $0x1f0] sm:$0xff] }
  0x55   :  { %710 = vmatprep.subr.bf16.mxu1 %v869_v0  ;;  %v759_v49 = vpack.c.bf16 %v360_v48, %v359_v47 }
  0x56   :  { %688 = vmatpush3.bf16.msra.mxu0 %v687_v43 }
  0x57   :  { %713 = vmatprep.subr.bf16.mxu0 %v869_v0 }
  0x58   :  { %712 = vmatpush3.bf16.msra.mxu1 %v711_v50  ;;  %v455_v50 = vld [vmem:[%s1006_s2 + $0x2] ss:$0 sm:$0xff] }
  0x59   :  { %558 = vmatmul.mubr.f32.vlgmr.msra.gmra.mrb[0].mxu0 %v57_v44  ;;  %737 = vmatprep.subr.bf16.mxu1 %v869_v0  ;;  %v357_v44 = vld [vmem:[#allocation5 + $0x1e0] sm:$0xff] }
  0x5a   :  { %627 = vmatprep.mubr.msk.f32.mxu0 %vm870_vm0, %v871_v1  ;;  %715 = vmatpush3.bf16.msra.mxu0 %v714_v54  ;;  %v756_v46 = vpack.c.bf16 %v358_v45, %v357_v44  ;;  %v342_v54 = vld [vmem:[#allocation7 + $0x10] sm:$0xff] }
  0x5b   :  { %716 = vmatprep.subr.bf16.mxu0 %v869_v0 }
  0x5e   :  { %718 = vmatpush3.bf16.msra.mxu0 %v717_v56 }
  0x5f   :  { %719 = vmatprep.subr.bf16.mxu0 %v869_v0 }
  0x62   :  { %721 = vmatpush3.bf16.msra.mxu0 %v720_v59 }
  0x63   :  { %722 = vmatprep.subr.bf16.mxu0 %v869_v0 }
  0x66   :  { %724 = vmatpush3.bf16.msra.mxu0 %v723_v62 }
  0x67   :  { %725 = vmatprep.subr.bf16.mxu0 %v869_v0 }
  0x6a   :  { %727 = vmatpush3.bf16.msra.mxu0 %v726_v3 }
  0x6b   :  { %728 = vmatprep.subr.bf16.mxu0 %v869_v0 }
  0x6e   :  { %730 = vmatpush3.bf16.msra.mxu0 %v729_v6 }
  0x6f   :  { %731 = vmatprep.subr.bf16.mxu0 %v869_v0 }
  0x72   :  { %733 = vmatpush3.bf16.msra.mxu0 %v732_v16 }
  0x73   :  { %734 = vmatprep.subr.bf16.mxu0 %v869_v0 }
  0x76   :  { %736 = vmatpush3.bf16.msra.mxu0 %v735_v19 }
 0x12c   :  { %v145_v8 = vpop.f32.mrb[0].mxu0 }
 0x12d   :  { %v146_v9 = vadd.f32 %v453_v7, %v145_v8  ;;  %v559_v10 = vpop.f32.mrb[1].mxu0 }
 0x12f   :  { %v149_v12 = vmax.f32 %v146_v9, 0.0 }
 0x131   :  { %v151_v13 = vmul.f32 %v150_v11, %v149_v12 }
 0x133   :  { %593 = vmatmul.mubr.f32.vlgmr.msra.gmra.mrb[0].mxu1 %v151_v13 }
 0x134   :  { %662 = vmatprep.mubr.msk.f32.mxu1 %vm870_vm0, %v871_v1  ;;  %739 = vmatpush3.bf16.msra.mxu1 %v738_v23  ;;  %v349_v1 = vld [vmem:[#allocation5 + $0x1a0] sm:$0xff] }
 0x135   :  { %740 = vmatprep.subr.bf16.mxu1 %v869_v0  ;;  %v744_v27 = vpack.c.bf16 %v350_v26, %v349_v1 }
 0x138   :  { %742 = vmatpush3.bf16.msra.mxu1 %v741_v25 }
 0x139   :  { %743 = vmatprep.subr.bf16.mxu1 %v869_v0 }
 0x13c   :  { %745 = vmatpush3.bf16.msra.mxu1 %v744_v27 }
 0x13d   :  { %746 = vmatprep.subr.bf16.mxu1 %v869_v0 }
 0x140   :  { %748 = vmatpush3.bf16.msra.mxu1 %v747_v30 }
 0x141   :  { %749 = vmatprep.subr.bf16.mxu1 %v869_v0 }
 0x144   :  { %751 = vmatpush3.bf16.msra.mxu1 %v750_v33 }
 0x145   :  { %752 = vmatprep.subr.bf16.mxu1 %v869_v0 }
 0x148   :  { %754 = vmatpush3.bf16.msra.mxu1 %v753_v36 }
 0x149   :  { %755 = vmatprep.subr.bf16.mxu1 %v869_v0 }
 0x14c   :  { %757 = vmatpush3.bf16.msra.mxu1 %v756_v46 }
 0x14d   :  { %758 = vmatprep.subr.bf16.mxu1 %v869_v0 }
 0x150   :  { %760 = vmatpush3.bf16.msra.mxu1 %v759_v49 }
 0x206   :  { %v240_v38 = vpop.f32.mrb[0].mxu1 }
 0x207   :  { %v241_v39 = vadd.f32 %v454_v37, %v240_v38  ;;  %v594_v40 = vpop.f32.mrb[1].mxu1 }
 0x209   :  { %v244_v42 = vmax.f32 %v241_v39, 0.0 }
 0x20b   :  { %v247_v43 = vmul.f32 %v246_v41, %v244_v42 }
 0x20d   :  { %628 = vmatmul.mubr.f32.vlgmr.msra.gmra.mrb[2].mxu0 %v247_v43 }
 0x2e0   :  { %v336_v51 = vpop.f32.mrb[2].mxu0 }
 0x2e1   :  { %v337_v52 = vadd.f32 %v455_v50, %v336_v51  ;;  %v629_v53 = vpop.f32.mrb[3].mxu0 }
 0x2e3   :  { %v340_v55 = vmax.f32 %v337_v52, 0.0 }
 0x2e5   :  { %v343_v56 = vmul.f32 %v342_v54, %v340_v55 }
 0x2e7   :  { %663 = vmatmul.mubr.f32.vlgmr.msra.gmra.mrb[2].mxu1 %v343_v56 }
 0x3ba   :  { %v432_v0 = vpop.f32.mrb[2].mxu1 }
 0x3bb   :  { %v433_v58 = vadd.f32 %v456_v57, %v432_v0  ;;  %v664_v59 = vpop.f32.mrb[3].mxu1 }
 0x3bd   :  { %436 = vst [vmem:[#allocation8] sm:$0xff] %v433_v58 }
 0x3be   :  { %847 = shalt.err (!%p844_p0)
}
 0x3bf   :  { %s848_s11 = scalar_lea.hbm %s1008_s4, 128 }
 0x3c0   :  { %p849_p1 = scmp.ne.s32.totalorder %s1008_s4, %s848_s11  ;;  %p852_p2 = scmp.lt.u32.totalorder %s848_s11, %s1008_s4 }
 0x3c2   :  { %p854_p3 = pnand %p852_p2, %p849_p1 }
 0x3c4   :  { %857 = shalt.err (!%p854_p3)
}
 0x3c5   :  { %446 = dma.vmem_to_hbm [thread:$0]  %s444_s7, 128, %s1008_s4, [#allocation4]  }
 0x3c6   :  { %862 = dma.done.wait [#allocation4], 128  }
 0x3c7   :  { %863 = vsyncadd [#allocation4], 4294967168 }
 0x3c8   :  { %450 = vsyncpa [#allocation3], 1 }
 0x3c9   :  { %451 = vsyncpa [#allocation6], 1 }
 0x3ca   :  { %452 = vsyncpa [#allocation4], 1 }

</bundles_post_ra>
